<compile_context>
chip_gen: v6e
topology: v6e:2x2x1
jax: 0.10.0
libtpu: 0.0.40
codegen_flags: <defaults>
</compile_context>

<pallas_src>
import functools
from inspect import signature

import jax
import jax.numpy as jnp
from jax.experimental import pallas as pl
from jax.experimental.pallas import tpu as pltpu

_BATCH_TILE = 128  # grid >= 2 per core at moderate batch; halves f32 scratch


def _default_bf16_tanh():
    """bf16 EUP/VPU path exists on v6e and newer; keep f32 tanh on <= v5."""
    try:
        kind = jax.devices()[0].device_kind.lower()
    except Exception:  # pragma: no cover - no device visible at import
        return False
    return not any(tag in kind for tag in ("v2", "v3", "v4", "v5"))


_BF16_TANH = _default_bf16_tanh()


def _pick_batch_tile(batch):
    """Largest tile <= _BATCH_TILE that divides the batch (full batch if small)."""
    if batch <= _BATCH_TILE:
        return batch
    for tb in (_BATCH_TILE, 64, 32, 16, 8):
        if batch % tb == 0:
            return tb
    return batch  # fallback: single tile (always correct)


# ----------------------------- Pallas kernel --------------------------------
def _drift_mlp_kernel(t_ref, x_ref, w1_ref, b1_ref, u1_ref, w2_ref, b2_ref,
                      o_ref, *, bf16_tanh):
    """One batch tile of f(t, x) = tanh(x W1 + b1 + t*u1) W2 + b2."""
    t = t_ref[0, 0]                                       # SMEM scalar
    x = x_ref[...]                                        # [TB, D]
    # MXU: bf16 operands, f32 accumulation (astype is a no-op for bf16 state).
    h = jnp.dot(x.astype(jnp.bfloat16), w1_ref[...],
                preferred_element_type=jnp.float32)       # [TB, H] f32
    pre = h + (b1_ref[...] + t * u1_ref[...])             # f32 bias adds (VPU)
    if bf16_tanh:
        # v6e/v7x: bf16 EUP tanh; result feeds the second MXU pass directly.
        hb = jnp.tanh(pre.astype(jnp.bfloat16))
    else:
        # v5e: no bf16 EUP/VPU -- keep tanh in f32, cast only for the MXU.
        hb = jnp.tanh(pre).astype(jnp.bfloat16)
    y = jnp.dot(hb, w2_ref[...],
                preferred_element_type=jnp.float32)       # [TB, D] f32
    o_ref[...] = (y + b2_ref[...]).astype(o_ref.dtype)


@functools.partial(jax.jit, static_argnames=("bf16_tanh",))
def drift_mlp_pallas(t, x, w1, b1, u1, w2, b2, bf16_tanh=False):
    """Fused drift MLP over the lane-dense flat state [B, D].

    Weights/biases are VMEM-resident (constant index_maps) across a parallel
    batch grid; only the x / output tiles stream through the pipeline.  The
    output dtype follows the state dtype (bf16 state => bf16 streamed bytes).
    """
    B, D = x.shape
    H = w1.shape[1]
    assert D % 128 == 0 and H % 128 == 0, "feature dims must be lane-dense"
    tb = _pick_batch_tile(B)
    assert B % tb == 0

    t_arr = jnp.asarray(t, jnp.float32).reshape(1, 1)
    kernel = functools.partial(_drift_mlp_kernel, bf16_tanh=bf16_tanh)

    return pl.pallas_call(
        kernel,
        out_shape=jax.ShapeDtypeStruct((B, D), x.dtype),
        grid=(B // tb,),
        in_specs=[
            pl.BlockSpec(memory_space=pltpu.MemorySpace.SMEM),   # t  (scalar)
            pl.BlockSpec((tb, D), lambda i: (i, 0)),             # x  (streamed)
            pl.BlockSpec((D, H), lambda i: (0, 0)),              # W1 (resident)
            pl.BlockSpec((1, H), lambda i: (0, 0)),              # b1 (resident)
            pl.BlockSpec((1, H), lambda i: (0, 0)),              # u1 (resident)
            pl.BlockSpec((H, D), lambda i: (0, 0)),              # W2 (resident)
            pl.BlockSpec((1, D), lambda i: (0, 0)),              # b2 (resident)
        ],
        out_specs=pl.BlockSpec((tb, D), lambda i: (i, 0)),
        compiler_params=pltpu.CompilerParams(
            dimension_semantics=("parallel",),
            vmem_limit_bytes=32 * 1024 * 1024,
        ),
    )(t_arr, x, w1, b1, u1, w2, b2)


# --------------------------- Wrapped net (drift) -----------------------------
class DriftNet:
    """Time-conditioned MLP drift taking (t, x) with x of shape
    [B, *input_shape]; returns the same shape.  Matches the two-parameter
    forward signature that ReshapeDiffEq asserts on."""

    def __init__(self, input_shape, hidden, key):
        self.input_shape = tuple(int(s) for s in input_shape)
        d = 1
        for s in self.input_shape:
            d *= s
        self.dim = d
        self.bf16_tanh = _BF16_TANH
        k1, k2, k3 = jax.random.split(key, 3)
        # bf16 weights (MXU operands only); f32 biases (VPU elementwise path).
        self.w1 = (jax.random.normal(k1, (d, hidden), jnp.float32)
                   / jnp.sqrt(d)).astype(jnp.bfloat16)
        self.b1 = jnp.zeros((1, hidden), jnp.float32)
        self.u1 = 0.1 * jax.random.normal(k2, (1, hidden), jnp.float32)
        self.w2 = (jax.random.normal(k3, (hidden, d), jnp.float32)
                   / jnp.sqrt(hidden)).astype(jnp.bfloat16)
        self.b2 = jnp.zeros((1, d), jnp.float32)

    def forward(self, t, x):
        # Perf note (call site, not kernel): in a tight solver loop, amortize
        # the per-call weight DMA by stacking SDE samples / ensemble members
        # into one larger batch per call, or by fusing several drift
        # evaluations per pallas_call (P10 cross-call prefetch also works).
        batch = x.shape[0]
        x_flat = x.reshape(batch, self.dim)            # lane-dense [B, D]
        y = drift_mlp_pallas(t, x_flat, self.w1, self.b1, self.u1,
                             self.w2, self.b2, bf16_tanh=self.bf16_tanh)
        return y.reshape(batch, *self.input_shape)

    def __call__(self, t, x):
        return self.forward(t, x)

    def __repr__(self):
        return (f"DriftNet(input_shape={self.input_shape}, "
                f"hidden={self.w1.shape[1]})")


# ------------------------------ ReshapeDiffEq --------------------------------
class ReshapeDiffEq:
    """Faithful port of the PyTorch ReshapeDiffEq reshape wrapper."""

    def __init__(self, input_shape, net):
        assert len(signature(net.forward).parameters) == 2, \
            'use diffeq_wrapper before reshape_wrapper.'
        self.input_shape = tuple(input_shape)
        self.net = net
        # Perf: resolve the wrapped forward once, not on every call.
        self._net_forward = net.forward

    def forward(self, t, x):
        batchsize = x.shape[0]
        x = x.reshape(batchsize, *self.input_shape)    # torch .view equivalent
        return self._net_forward(t, x).reshape(batchsize, -1)

    def __call__(self, t, x):
        return self.forward(t, x)

    def __repr__(self):
        # Original references self.diffeq (absent attribute); report the net.
        return self.net.__repr__()


# ---------------------------------- main -------------------------------------
if __name__ == "__main__":
    key = jax.random.PRNGKey(0)
    k_x, k_net = jax.random.split(key)

    # Flat state viewed as (C, H, W) by ReshapeDiffEq.  Small demo shapes,
    # kept lane-dense: D = 4*16*16 = 1024, hidden = 128.
    channels, height, width = 4, 16, 16
    input_shape = (channels, height, width)
    dim = channels * height * width        # 1024 -> lane-dense
    hidden = 128                           # multiple of 128
    batch = 2                              # small demo batch (single tile)

    net = DriftNet(input_shape, hidden, k_net)
    wrapper = ReshapeDiffEq(input_shape, net)

    # bf16 state end-to-end (perf review: cuts streamed HBM bytes on v6e/v7x).
    # The kernel handles an f32 state identically (output follows x.dtype).
    x_flat = jax.random.normal(k_x, (batch, dim), jnp.float32).astype(jnp.bfloat16)
    t = jnp.float32(0.5)

    out = wrapper(t, x_flat)
    out = jax.block_until_ready(out)
    assert out.shape == (batch, dim)
    assert out.dtype == x_flat.dtype

    # Plain-JAX reference with identical dtype plan (bf16 MXU operands,
    # f32 accumulation, chip-matched tanh precision, bf16 output).
    xb = x_flat.astype(jnp.bfloat16)
    pre = (jnp.dot(xb, net.w1, preferred_element_type=jnp.float32)
           + net.b1 + t * net.u1)
    if net.bf16_tanh:
        h = jnp.tanh(pre.astype(jnp.bfloat16))
    else:
        h = jnp.tanh(pre).astype(jnp.bfloat16)
    ref = (jnp.dot(h, net.w2, preferred_element_type=jnp.float32) + net.b2)
    ref = ref.astype(out.dtype)

    err = jnp.max(jnp.abs(out.astype(jnp.float32) - ref.astype(jnp.float32)))
    assert err < 5e-2, float(err)

    print("KERNEL_OK")
</pallas_src>

<mosaic_0001>
module attributes {stable_mosaic.version = 11 : i64} {
  func.func @_drift_mlp_kernel(%arg0: i32, %arg1: memref<1x1xf32, #tpu.memory_space<smem>>, %arg2: memref<2x1024xbf16, #tpu.memory_space<vmem>>, %arg3: memref<1024x128xbf16, #tpu.memory_space<vmem>>, %arg4: memref<1x128xf32, #tpu.memory_space<vmem>>, %arg5: memref<1x128xf32, #tpu.memory_space<vmem>>, %arg6: memref<128x1024xbf16, #tpu.memory_space<vmem>>, %arg7: memref<1x1024xf32, #tpu.memory_space<vmem>>, %arg8: memref<2x1024xbf16, #tpu.memory_space<vmem>>) attributes {dimension_semantics = [#tpu.dimension_semantics<parallel>], iteration_bounds = array<i64: 1>, scalar_prefetch = 0 : i64, scratch_operands = 0 : i64, tpu.core_type = #tpu.core_type<tc>, window_params = [{transform_indices = @transform_0, window_bounds = array<i64: 1, 1>}, {transform_indices = @transform_1, window_bounds = array<i64: 2, 1024>}, {pipeline_mode = #tpu.pipeline_mode<synchronous>, transform_indices = @transform_2, window_bounds = array<i64: 1024, 128>}, {pipeline_mode = #tpu.pipeline_mode<synchronous>, transform_indices = @transform_3, window_bounds = array<i64: 1, 128>}, {pipeline_mode = #tpu.pipeline_mode<synchronous>, transform_indices = @transform_4, window_bounds = array<i64: 1, 128>}, {pipeline_mode = #tpu.pipeline_mode<synchronous>, transform_indices = @transform_5, window_bounds = array<i64: 128, 1024>}, {pipeline_mode = #tpu.pipeline_mode<synchronous>, transform_indices = @transform_6, window_bounds = array<i64: 1, 1024>}, {transform_indices = @transform_7, window_bounds = array<i64: 2, 1024>}]} {
    %c0 = arith.constant 0 : index
    %c0_0 = arith.constant 0 : index
    %0 = memref.load %arg1[%c0, %c0_0] : memref<1x1xf32, #tpu.memory_space<smem>>
    %c0_1 = arith.constant 0 : index
    %c0_2 = arith.constant 0 : index
    %1 = vector.load %arg2[%c0_1, %c0_2] : memref<2x1024xbf16, #tpu.memory_space<vmem>>, vector<2x1024xbf16>
    %c0_3 = arith.constant 0 : index
    %c0_4 = arith.constant 0 : index
    %2 = vector.load %arg3[%c0_3, %c0_4] : memref<1024x128xbf16, #tpu.memory_space<vmem>>, vector<1024x128xbf16>
    %cst = arith.constant dense<0.000000e+00> : vector<2x128xf32>
    %3 = tpu.matmul %1, %2, %cst {dimension_numbers = #tpu.dot_dimension_numbers<[1], [0], [0], [1], [0, 0, 1, 1], [], []>} : vector<2x1024xbf16>, vector<1024x128xbf16>, vector<2x128xf32> -> vector<2x128xf32>
    %c0_5 = arith.constant 0 : index
    %c0_6 = arith.constant 0 : index
    %4 = vector.load %arg4[%c0_5, %c0_6] : memref<1x128xf32, #tpu.memory_space<vmem>>, vector<1x128xf32>
    %c0_7 = arith.constant 0 : index
    %c0_8 = arith.constant 0 : index
    %5 = vector.load %arg5[%c0_7, %c0_8] : memref<1x128xf32, #tpu.memory_space<vmem>>, vector<1x128xf32>
    %6 = vector.broadcast %0 : f32 to vector<1x128xf32>
    %7 = arith.mulf %6, %5 : vector<1x128xf32>
    %8 = arith.addf %4, %7 : vector<1x128xf32>
    %9 = vector.broadcast %8 : vector<1x128xf32> to vector<2x128xf32>
    %10 = arith.addf %3, %9 : vector<2x128xf32>
    %11 = arith.truncf %10 : vector<2x128xf32> to vector<2x128xbf16>
    %12 = math.tanh %11 : vector<2x128xbf16>
    %c0_9 = arith.constant 0 : index
    %c0_10 = arith.constant 0 : index
    %13 = vector.load %arg6[%c0_9, %c0_10] : memref<128x1024xbf16, #tpu.memory_space<vmem>>, vector<128x1024xbf16>
    %cst_11 = arith.constant dense<0.000000e+00> : vector<2x1024xf32>
    %14 = tpu.matmul %12, %13, %cst_11 {dimension_numbers = #tpu.dot_dimension_numbers<[1], [0], [0], [1], [0, 0, 1, 1], [], []>} : vector<2x128xbf16>, vector<128x1024xbf16>, vector<2x1024xf32> -> vector<2x1024xf32>
    %c0_12 = arith.constant 0 : index
    %c0_13 = arith.constant 0 : index
    %15 = vector.load %arg7[%c0_12, %c0_13] : memref<1x1024xf32, #tpu.memory_space<vmem>>, vector<1x1024xf32>
    %16 = vector.broadcast %15 : vector<1x1024xf32> to vector<2x1024xf32>
    %17 = arith.addf %14, %16 : vector<2x1024xf32>
    %18 = arith.truncf %17 : vector<2x1024xf32> to vector<2x1024xbf16>
    %c0_14 = arith.constant 0 : index
    %c0_15 = arith.constant 0 : index
    %19 = vector.load %arg8[%c0_14, %c0_15] : memref<2x1024xbf16, #tpu.memory_space<vmem>>, vector<2x1024xbf16>
    tpu.vector_store %arg8[%c0_14, %c0_15], %18 {strides = array<i32>} : memref<2x1024xbf16, #tpu.memory_space<vmem>>, vector<2x1024xbf16>,
    return
  }
  func.func @transform_0(%arg0: i32) -> (i32, i32) {
    %c0_i32 = arith.constant 0 : i32
    %c0_i32_0 = arith.constant 0 : i32
    %c0_i32_1 = arith.constant 0 : i32
    return %c0_i32, %c0_i32_0 : i32, i32
  }
  func.func @transform_1(%arg0: i32) -> (i32, i32) {
    %c0_i32 = arith.constant 0 : i32
    %c0_i32_0 = arith.constant 0 : i32
    return %arg0, %c0_i32 : i32, i32
  }
  func.func @transform_2(%arg0: i32) -> (i32, i32) {
    %c0_i32 = arith.constant 0 : i32
    %c0_i32_0 = arith.constant 0 : i32
    %c0_i32_1 = arith.constant 0 : i32
    return %c0_i32, %c0_i32_0 : i32, i32
  }
  func.func @transform_3(%arg0: i32) -> (i32, i32) {
    %c0_i32 = arith.constant 0 : i32
    %c0_i32_0 = arith.constant 0 : i32
    %c0_i32_1 = arith.constant 0 : i32
    return %c0_i32, %c0_i32_0 : i32, i32
  }
  func.func @transform_4(%arg0: i32) -> (i32, i32) {
    %c0_i32 = arith.constant 0 : i32
    %c0_i32_0 = arith.constant 0 : i32
    %c0_i32_1 = arith.constant 0 : i32
    return %c0_i32, %c0_i32_0 : i32, i32
  }
  func.func @transform_5(%arg0: i32) -> (i32, i32) {
    %c0_i32 = arith.constant 0 : i32
    %c0_i32_0 = arith.constant 0 : i32
    %c0_i32_1 = arith.constant 0 : i32
    return %c0_i32, %c0_i32_0 : i32, i32
  }
  func.func @transform_6(%arg0: i32) -> (i32, i32) {
    %c0_i32 = arith.constant 0 : i32
    %c0_i32_0 = arith.constant 0 : i32
    %c0_i32_1 = arith.constant 0 : i32
    return %c0_i32, %c0_i32_0 : i32, i32
  }
  func.func @transform_7(%arg0: i32) -> (i32, i32) {
    %c0_i32 = arith.constant 0 : i32
    %c0_i32_0 = arith.constant 0 : i32
    return %arg0, %c0_i32 : i32, i32
  }
}

</mosaic_0001>

<bundles_post_ra>
// kernel: drift_mlp_pallas.1
= control target key start
LH: loop header
LB: loop body
LE: loop exit
PB: predicated region body
PF: predicated region fallthrough
CT: control target
= control target key end

     0   :  { %13 = vsyncpa [#allocation4], 0  ;;  %s2006_s0 = inlined_call_operand.<no memory space> [shape: f32[1,1], index: 0, kind: input, shape index: {}]   ;;  %s2007_s1 = inlined_call_operand.hbm [shape: bf16[2,1024], index: 1, kind: input, shape index: {}]   ;;  %s2008_s2 = inlined_call_operand.hbm [shape: bf16[1024,128], index: 2, kind: input, shape index: {}]   ;;  %s2009_s3 = inlined_call_operand.vmem [shape: f32[1,128], index: 3, kind: input, shape index: {}]   ;;  %s2010_s4 = inlined_call_operand.vmem [shape: f32[1,128], index: 4, kind: input, shape index: {}]   ;;  %s2011_s5 = inlined_call_operand.hbm [shape: bf16[128,1024], index: 5, kind: input, shape index: {}]   ;;  %s2012_s6 = inlined_call_operand.vmem [shape: f32[1,1024], index: 6, kind: input, shape index: {}]   ;;  %s2013_s7 = inlined_call_operand.hbm [shape: bf16[2,1024], index: 7, kind: output, shape index: {}]  }
   0x1   :  { %14 = vsyncpa [#allocation7], 0 }
   0x2   :  { %15 = vsyncpa [#allocation5], 0  ;;  %s1869_s24 = smov [#allocation6]  }
   0x3   :  { %s33_s25 = sshll.u32 %s1869_s24, 4  ;;  %s34_s25 = int_to_ptr.vmem [resolvable:$true] %s33_s25 }
   0x4   :  { %s1791_s26 = scalar_lea.vmem %s34_s25, 8192  ;;  %p1796_p1 = scmp.lt.s32.totalorder %s34_s25, %s34_s25 }
   0x5   :  { %p1792_p0 = scmp.ne.s32.totalorder %s34_s25, %s1791_s26  ;;  %p1797_p2 = scmp.lt.s32.totalorder %s1791_s26, %s1791_s26 }
   0x7   :  { %p1798_p3 = por %p1797_p2, %p1796_p1 }
   0x9   :  { %p1799_p4 = pnand %p1798_p3, %p1792_p0 }
   0xb   :  { %1802 = shalt.err (!%p1799_p4)
}
   0xc   :  { %s1870_s27 = smov 64   ;;  %s1871_s28 = smov 4  }
   0xd   :  { %39 = dma.hbm_to_vmem [thread:$0]  %s2008_s2, 8192, %s34_s25, [#allocation7], %s1870_s27, %s1870_s27, %s1871_s28  }
   0xe   :  { %s1872_s8 = smov [#allocation3]   ;;  %s1873_s10 = smov [#allocation8]  }
   0xf   :  { %s24_s9 = sshll.u32 %s1872_s8, 4  ;;  %s49_s11 = sshll.u32 %s1873_s10, 4  ;;  %s25_s9 = int_to_ptr.vmem [resolvable:$true] %s24_s9  ;;  %s50_s11 = int_to_ptr.vmem [resolvable:$true] %s49_s11 }
  0x10   :  { %s1811_s12 = scalar_lea.vmem %s25_s9, 128  ;;  %p1816_p6 = scmp.lt.s32.totalorder %s25_s9, %s25_s9 }
  0x11   :  { %p1812_p5 = scmp.ne.s32.totalorder %s25_s9, %s1811_s12  ;;  %p1817_p7 = scmp.lt.s32.totalorder %s1811_s12, %s1811_s12 }
  0x13   :  { %p1818_p8 = por %p1817_p7, %p1816_p6 }
  0x15   :  { %p1819_p9 = pnand %p1818_p8, %p1812_p5 }
  0x17   :  { %1822 = shalt.err (!%p1819_p9)
}
  0x18   :  { %27 = dma.hbm_to_vmem [thread:$0]  %s2007_s1, 128, %s25_s9, [#allocation4]  }
  0x19   :  { %s1831_s15 = scalar_lea.vmem %s50_s11, 8192  ;;  %p1836_p11 = scmp.lt.s32.totalorder %s50_s11, %s50_s11 }
  0x1a   :  { %p1832_p10 = scmp.ne.s32.totalorder %s50_s11, %s1831_s15  ;;  %p1837_p12 = scmp.lt.s32.totalorder %s1831_s15, %s1831_s15 }
  0x1c   :  { %p1838_p13 = por %p1837_p12, %p1836_p11 }
  0x1e   :  { %p1839_p0 = pnand %p1838_p13, %p1832_p10 }
  0x20   :  { %1842 = shalt.err (!%p1839_p0)
}
  0x21   :  { %s1874_s2 = smov 512   ;;  %s1875_s16 = smov 32  }
  0x22   :  { %55 = dma.hbm_to_vmem [thread:$0]  %s2011_s5, 8192, %s50_s11, [#allocation7], %s1874_s2, %s1874_s2, %s1875_s16  }
  0x23   :  { %1863 = dma.done.wait [#allocation4], 128  }
  0x24   :  { %1864 = vsyncadd [#allocation4], 4294967168 }
  0x25   :  { %1865 = dma.done.wait [#allocation7], 16384  }
  0x26   :  { %1866 = vsyncadd [#allocation7], 4294950912  ;;  %v1716_v0 = vld [vmem:[#allocation6 + $0x78] sm:$0xff]   ;;  %v1720_v4 = vld [vmem:[#allocation6 + $0x70] sm:$0xff]   ;;  %v204_v22 = vlaneseq  ;;  %v1876_v23 = vmov 1966171168  }
  0x27   :  { %v1717_v1 = vld [vmem:[#allocation6 + $0xf8] sm:$0xff]   ;;  %1618 = vmatprep.subr.bf16.mxu0 %v1716_v0  ;;  %v1721_v5 = vld [vmem:[#allocation6 + $0xf0] sm:$0xff]   ;;  %v1724_v8 = vld [vmem:[#allocation6 + $0x68] sm:$0xff]   ;;  %v212_v24 = vunpack.c.l.s4 %v1876_v23 }
  0x28   :  { %v1718_v2 = vld [vmem:[#allocation6 + $0x38] sm:$0xff]   ;;  %1640 = vmatprep.subr.bf16.mxu1 %v1717_v1  ;;  %v1722_v6 = vld [vmem:[#allocation6 + $0x30] sm:$0xff]   ;;  %v1725_v9 = vld [vmem:[#allocation6 + $0xe8] sm:$0xff]   ;;  %v1928_v29 = vshrl.u32 %v204_v22, 7 }
  0x29   :  { %v1719_v3 = vld [vmem:[#allocation6 + $0xb8] sm:$0xff]   ;;  %1619 = vmatpush3.bf16.msra.mxu0 %v1718_v2  ;;  %v1723_v7 = vld [vmem:[#allocation6 + $0xb0] sm:$0xff]   ;;  %v1726_v10 = vld [vmem:[#allocation6 + $0x28] sm:$0xff]   ;;  %v213_v30 = vunpack.c.0.s8 %v212_v24 }
  0x2a   :  { %1641 = vmatpush3.bf16.msra.mxu1 %v1719_v3  ;;  %1620 = vmatprep.subr.bf16.mxu0 %v1720_v4  ;;  %v1727_v11 = vld [vmem:[#allocation6 + $0xa8] sm:$0xff]   ;;  %v1728_v12 = vld [vmem:[#allocation6 + $0x60] sm:$0xff]   ;;  %v1732_v16 = vld [vmem:[#allocation6 + $0x58] sm:$0xff]  }
  0x2b   :  { %1642 = vmatprep.subr.bf16.mxu1 %v1721_v5  ;;  %v1729_v13 = vld [vmem:[#allocation6 + $0xe0] sm:$0xff]   ;;  %v1733_v17 = vld [vmem:[#allocation6 + $0xd8] sm:$0xff]   ;;  %v1736_v20 = vld [vmem:[#allocation6 + $0x50] sm:$0xff]   ;;  %v1931_v35 = vsub.s32 %v213_v30, %v1928_v29 }
  0x2c   :  { %v1730_v14 = vld [vmem:[#allocation6 + $0x20] sm:$0xff]   ;;  %v1734_v18 = vld [vmem:[#allocation6 + $0x18] sm:$0xff]   ;;  %v1737_v21 = vld [vmem:[#allocation6 + $0xd0] sm:$0xff]  }
  0x2d   :  { %1621 = vmatpush3.bf16.msra.mxu0 %v1722_v6  ;;  %v1731_v15 = vld [vmem:[#allocation6 + $0xa0] sm:$0xff]   ;;  %v1735_v19 = vld [vmem:[#allocation6 + $0x98] sm:$0xff]   ;;  %v1738_v25 = vld [vmem:[#allocation6 + $0x10] sm:$0xff]  }
  0x2e   :  { %1643 = vmatpush3.bf16.msra.mxu1 %v1723_v7  ;;  %1622 = vmatprep.subr.bf16.mxu0 %v1724_v8  ;;  %v1739_v26 = vld [vmem:[#allocation6 + $0x90] sm:$0xff]   ;;  %v1740_v27 = vld [vmem:[#allocation6 + $0x48] sm:$0xff]   ;;  %v1744_v33 = vld [vmem:[#allocation6 + $0x40] sm:$0xff]  }
  0x2f   :  { %1644 = vmatprep.subr.bf16.mxu1 %v1725_v9  ;;  %v1741_v28 = vld [vmem:[#allocation6 + $0xc8] sm:$0xff]   ;;  %v1745_v34 = vld [vmem:[#allocation6 + $0xc0] sm:$0xff]   ;;  %v69_v38 = vld [vmem:[#allocation3] sm:$0xff] }
  0x30   :  { %v1742_v31 = vld [vmem:[#allocation6 + $0x8] sm:$0xff]   ;;  %v1746_v36 = vld [vmem:[#allocation6] sm:$0xff]   ;;  %v210_v39 = vcombine.high %v69_v38, %v69_v38  ;;  %v217_v40 = vrot.slane %v69_v38, %v1931_v35  ;;  %v1749_v41 = vld [vmem:[#allocation6 + $0x178] sm:$0xff]  }
  0x31   :  { %1623 = vmatpush3.bf16.msra.mxu0 %v1726_v10  ;;  %v1743_v32 = vld [vmem:[#allocation6 + $0x88] sm:$0xff]   ;;  %v1747_v37 = vld [vmem:[#allocation6 + $0x80] sm:$0xff]   ;;  %v1750_v42 = vld [vmem:[#allocation6 + $0x1f8] sm:$0xff]  }
  0x32   :  { %1645 = vmatpush3.bf16.msra.mxu1 %v1727_v11  ;;  %1624 = vmatprep.subr.bf16.mxu0 %v1728_v12  ;;  %v225_v43 = vcombine.high %v217_v40, %v217_v40  ;;  %v233_v44 = vrot.slane %v217_v40, %v1931_v35  ;;  %v1936_v45 = vrot.slane %v210_v39, %v1931_v35  ;;  %v1751_v47 = vld [vmem:[#allocation6 + $0x138] sm:$0xff]   ;;  %v1753_v50 = vld [vmem:[#allocation6 + $0x170] sm:$0xff]   ;;  %v1757_v57 = vld [vmem:[#allocation6 + $0x168] sm:$0xff]  }
  0x33   :  { %1646 = vmatprep.subr.bf16.mxu1 %v1729_v13  ;;  %v1752_v52 = vld [vmem:[#allocation6 + $0x1b8] sm:$0xff]   ;;  %v1754_v54 = vld [vmem:[#allocation6 + $0x1f0] sm:$0xff]   ;;  %v1758_v59 = vld [vmem:[#allocation6 + $0x1e8] sm:$0xff]  }
  0x34   :  { %v247_v46 = vrot.slane %v225_v43, %v1931_v35  ;;  %v226_v48 = vcombine.high %v1936_v45, %v1936_v45  ;;  %v255_v49 = vcombine.high %v233_v44, %v233_v44  ;;  %v1755_v55 = vld [vmem:[#allocation6 + $0x130] sm:$0xff]   ;;  %v1759_v60 = vld [vmem:[#allocation6 + $0x128] sm:$0xff]   ;;  %v1761_v61 = vld [vmem:[#allocation6 + $0x160] sm:$0xff]  }
  0x35   :  { %1625 = vmatpush3.bf16.msra.mxu0 %v1730_v14  ;;  %v1756_v58 = vld [vmem:[#allocation6 + $0x1b0] sm:$0xff]   ;;  %v1760_v62 = vld [vmem:[#allocation6 + $0x1a8] sm:$0xff]   ;;  %v1762_v63 = vld [vmem:[#allocation6 + $0x1e0] sm:$0xff]  }
  0x36   :  { %1647 = vmatpush3.bf16.msra.mxu1 %v1731_v15  ;;  %1626 = vmatprep.subr.bf16.mxu0 %v1732_v16  ;;  %v257_v51 = vcombine.high %v247_v46, %v247_v46  ;;  %v254_v53 = vrot.slane %v226_v48, %v1931_v35  ;;  %v1763_v0 = vld [vmem:[#allocation6 + $0x120] sm:$0xff]   ;;  %v1765_v1 = vld [vmem:[#allocation6 + $0x158] sm:$0xff]   ;;  %v1769_v5 = vld [vmem:[#allocation6 + $0x150] sm:$0xff]  }
  0x37   :  { %1648 = vmatprep.subr.bf16.mxu1 %v1733_v17  ;;  %683 = vmatprep.mubr.bf16.mxu0 %v247_v46  ;;  %v1764_v2 = vld [vmem:[#allocation6 + $0x1a0] sm:$0xff]   ;;  %v1766_v3 = vld [vmem:[#allocation6 + $0x1d8] sm:$0xff]   ;;  %v1770_v7 = vld [vmem:[#allocation6 + $0x1d0] sm:$0xff]   ;;  %v240_v17 = vrot.slane %v1936_v45, %v1931_v35 }
  0x38   :  { %723 = vmatprep.mubr.bf16.mxu1 %v257_v51  ;;  %v258_v56 = vcombine.high %v254_v53, %v254_v53  ;;  %v1767_v4 = vld [vmem:[#allocation6 + $0x118] sm:$0xff]   ;;  %v1771_v8 = vld [vmem:[#allocation6 + $0x110] sm:$0xff]   ;;  %v1773_v9 = vld [vmem:[#allocation6 + $0x148] sm:$0xff]  }
  0x39   :  { %1627 = vmatpush3.bf16.msra.mxu0 %v1734_v18  ;;  %v1768_v6 = vld [vmem:[#allocation6 + $0x198] sm:$0xff]   ;;  %v1772_v10 = vld [vmem:[#allocation6 + $0x190] sm:$0xff]   ;;  %v1774_v11 = vld [vmem:[#allocation6 + $0x1c8] sm:$0xff]  }
  0x3a   :  { %1649 = vmatpush3.bf16.msra.mxu1 %v1735_v19  ;;  %1628 = vmatprep.subr.bf16.mxu0 %v1736_v20  ;;  %v1775_v12 = vld [vmem:[#allocation6 + $0x108] sm:$0xff]   ;;  %v1777_v13 = vld [vmem:[#allocation6 + $0x140] sm:$0xff]   ;;  %v256_v19 = vcombine.high %v240_v17, %v240_v17 }
  0x3b   :  { %1650 = vmatprep.subr.bf16.mxu1 %v1737_v21  ;;  %v1776_v14 = vld [vmem:[#allocation6 + $0x188] sm:$0xff]   ;;  %v1778_v15 = vld [vmem:[#allocation6 + $0x1c0] sm:$0xff]  }
  0x3c   :  { %v1779_v16 = vld [vmem:[#allocation6 + $0x100] sm:$0xff]   ;;  %v870_v22 = vld [vmem:[#allocation8 + $0x1c8] sm:$0xff] }
  0x3d   :  { %1629 = vmatpush3.bf16.msra.mxu0 %v1738_v25  ;;  %v1780_v18 = vld [vmem:[#allocation6 + $0x180] sm:$0xff]   ;;  %v874_v25 = vld [vmem:[#allocation8 + $0x1e8] sm:$0xff] }
  0x3e   :  { %1651 = vmatpush3.bf16.msra.mxu1 %v1739_v26  ;;  %1630 = vmatprep.subr.bf16.mxu0 %v1740_v27  ;;  %v869_v20 = vld [vmem:[#allocation8 + $0x1c0] sm:$0xff]  ;;  %v1609_v30 = vcombine.high %v870_v22, %v874_v25  ;;  %v854_v40 = vld [vmem:[#allocation8 + $0x148] sm:$0xff] }
  0x3f   :  { %1652 = vmatprep.subr.bf16.mxu1 %v1741_v28  ;;  %v873_v21 = vld [vmem:[#allocation8 + $0x1e0] sm:$0xff]  ;;  %v1608_v28 = vcombine.low %v870_v22, %v874_v25  ;;  %v846_v48 = vld [vmem:[#allocation8 + $0x108] sm:$0xff]  ;;  %v1954_v22 = vld [vmem:[#allocation8 + $0x1f8] sm:$0xff] }
  0x40   :  { %v1606_v23 = vcombine.low %v869_v20, %v873_v21  ;;  %v1607_v24 = vcombine.high %v869_v20, %v873_v21  ;;  %v861_v26 = vld [vmem:[#allocation8 + $0x180] sm:$0xff] }
  0x41   :  { %1631 = vmatpush3.bf16.msra.mxu0 %v1742_v31  ;;  %v865_v27 = vld [vmem:[#allocation8 + $0x1a0] sm:$0xff] }
  0x42   :  { %1653 = vmatpush3.bf16.msra.mxu1 %v1743_v32  ;;  %1632 = vmatprep.subr.bf16.mxu0 %v1744_v33  ;;  %v1599_v31 = vcombine.high %v861_v26, %v865_v27  ;;  %v862_v32 = vld [vmem:[#allocation8 + $0x188] sm:$0xff]  ;;  %v853_v38 = vld [vmem:[#allocation8 + $0x140] sm:$0xff] }
  0x43   :  { %1654 = vmatprep.subr.bf16.mxu1 %v1745_v34  ;;  %v866_v33 = vld [vmem:[#allocation8 + $0x1a8] sm:$0xff]  ;;  %v857_v39 = vld [vmem:[#allocation8 + $0x160] sm:$0xff] }
  0x44   :  { %v1601_v34 = vcombine.high %v862_v32, %v866_v33  ;;  %v1590_v43 = vcombine.low %v853_v38, %v857_v39  ;;  %v845_v46 = vld [vmem:[#allocation8 + $0x100] sm:$0xff] }
  0x45   :  { %1633 = vmatpush3.bf16.msra.mxu0 %v1746_v36  ;;  %v1598_v36 = vcombine.low %v861_v26, %v865_v27 }
  0x46   :  { %1655 = vmatpush3.bf16.msra.mxu1 %v1747_v37  ;;  %1662 = vmatprep.subr.bf16.mxu0 %v1749_v41  ;;  %v1600_v37 = vcombine.low %v862_v32, %v866_v33  ;;  %v1591_v41 = vcombine.high %v853_v38, %v857_v39 }
  0x47   :  { %1684 = vmatprep.subr.bf16.mxu1 %v1750_v42  ;;  %v858_v42 = vld [vmem:[#allocation8 + $0x168] sm:$0xff] }
  0x48   :  { %684 = vmatmul.mubr.bf16.vlgmr.msra.gmra.mxu0 %v233_v44  ;;  %v1592_v44 = vcombine.low %v854_v40, %v858_v42  ;;  %v1593_v45 = vcombine.high %v854_v40, %v858_v42  ;;  %v200_v42 = vstv %s2006_s0 }
  0x49   :  { %1663 = vmatpush3.bf16.msra.mxu0 %v1751_v47  ;;  %724 = vmatmul.mubr.bf16.vlgmr.msra.gmra.mxu1 %v255_v49  ;;  %v849_v47 = vld [vmem:[#allocation8 + $0x120] sm:$0xff] }
  0x4a   :  { %1664 = vmatprep.subr.bf16.mxu0 %v1753_v50  ;;  %1685 = vmatpush3.bf16.msra.mxu1 %v1752_v52  ;;  %v1583_v49 = vcombine.high %v845_v46, %v849_v47  ;;  %v850_v50 = vld [vmem:[#allocation8 + $0x128] sm:$0xff]  ;;  %v1582_v51 = vcombine.low %v845_v46, %v849_v47  ;;  %v206_v46 = vsub.s32 0, %v1928_v29 }
  0x4b   :  { %763 = vmatprep.mubr.bf16.mxu0 %v254_v53  ;;  %1686 = vmatprep.subr.bf16.mxu1 %v1754_v54  ;;  %v1584_v52 = vcombine.low %v846_v48, %v850_v50  ;;  %v1585_v53 = vcombine.high %v846_v48, %v850_v50  ;;  %v837_v54 = vld [vmem:[#allocation8 + $0xc0] sm:$0xff] }
  0x4c   :  { %803 = vmatprep.mubr.bf16.mxu1 %v258_v56  ;;  %v838_v56 = vld [vmem:[#allocation8 + $0xc8] sm:$0xff] }
  0x4d   :  { %1665 = vmatpush3.bf16.msra.mxu0 %v1755_v55  ;;  %v841_v55 = vld [vmem:[#allocation8 + $0xe0] sm:$0xff] }
  0x4e   :  { %1666 = vmatprep.subr.bf16.mxu0 %v1757_v57  ;;  %1687 = vmatpush3.bf16.msra.mxu1 %v1756_v58  ;;  %v1575_v57 = vcombine.high %v837_v54, %v841_v55  ;;  %v842_v58 = vld [vmem:[#allocation8 + $0xe8] sm:$0xff] }
  0x4f   :  { %1688 = vmatprep.subr.bf16.mxu1 %v1758_v59  ;;  %v1574_v59 = vcombine.low %v837_v54, %v841_v55 }
  0x51   :  { %1667 = vmatpush3.bf16.msra.mxu0 %v1759_v60  ;;  %v1576_v60 = vcombine.low %v838_v56, %v842_v58 }
  0x52   :  { %1668 = vmatprep.subr.bf16.mxu0 %v1761_v61  ;;  %1689 = vmatpush3.bf16.msra.mxu1 %v1760_v62  ;;  %v1577_v61 = vcombine.high %v838_v56, %v842_v58  ;;  %v829_v62 = vld [vmem:[#allocation8 + $0x80] sm:$0xff] }
  0x53   :  { %1690 = vmatprep.subr.bf16.mxu1 %v1762_v63  ;;  %v833_v63 = vld [vmem:[#allocation8 + $0xa0] sm:$0xff] }
  0x55   :  { %1669 = vmatpush3.bf16.msra.mxu0 %v1763_v0  ;;  %v830_v0 = vld [vmem:[#allocation8 + $0x88] sm:$0xff] }
  0x56   :  { %1670 = vmatprep.subr.bf16.mxu0 %v1765_v1  ;;  %1691 = vmatpush3.bf16.msra.mxu1 %v1764_v2  ;;  %v1566_v1 = vcombine.low %v829_v62, %v833_v63  ;;  %v1567_v2 = vcombine.high %v829_v62, %v833_v63 }
  0x57   :  { %1692 = vmatprep.subr.bf16.mxu1 %v1766_v3  ;;  %v834_v3 = vld [vmem:[#allocation8 + $0xa8] sm:$0xff] }
  0x59   :  { %1671 = vmatpush3.bf16.msra.mxu0 %v1767_v4  ;;  %v821_v4 = vld [vmem:[#allocation8 + $0x40] sm:$0xff] }
  0x5a   :  { %1672 = vmatprep.subr.bf16.mxu0 %v1769_v5  ;;  %1693 = vmatpush3.bf16.msra.mxu1 %v1768_v6  ;;  %v825_v5 = vld [vmem:[#allocation8 + $0x60] sm:$0xff]  ;;  %v1568_v6 = vcombine.low %v830_v0, %v834_v3 }
  0x5b   :  { %1694 = vmatprep.subr.bf16.mxu1 %v1770_v7  ;;  %v1569_v7 = vcombine.high %v830_v0, %v834_v3  ;;  %v1558_v20 = vcombine.low %v821_v4, %v825_v5  ;;  %v864_v3 = vld [vmem:[#allocation8 + $0x198] sm:$0xff] }
  0x5d   :  { %1673 = vmatpush3.bf16.msra.mxu0 %v1771_v8  ;;  %v1559_v8 = vcombine.high %v821_v4, %v825_v5  ;;  %v868_v4 = vld [vmem:[#allocation8 + $0x1b8] sm:$0xff] }
  0x5e   :  { %1674 = vmatprep.subr.bf16.mxu0 %v1773_v9  ;;  %1695 = vmatpush3.bf16.msra.mxu1 %v1772_v10  ;;  %v822_v9 = vld [vmem:[#allocation8 + $0x48] sm:$0xff] }
  0x5f   :  { %1696 = vmatprep.subr.bf16.mxu1 %v1774_v11  ;;  %v826_v10 = vld [vmem:[#allocation8 + $0x68] sm:$0xff]  ;;  %v813_v11 = vld [vmem:[#allocation8] sm:$0xff] }
  0x61   :  { %1675 = vmatpush3.bf16.msra.mxu0 %v1775_v12  ;;  %v1561_v12 = vcombine.high %v822_v9, %v826_v10 }
  0x62   :  { %1676 = vmatprep.subr.bf16.mxu0 %v1777_v13  ;;  %1697 = vmatpush3.bf16.msra.mxu1 %v1776_v14  ;;  %v817_v13 = vld [vmem:[#allocation8 + $0x20] sm:$0xff]  ;;  %v814_v14 = vld [vmem:[#allocation8 + $0x8] sm:$0xff] }
  0x63   :  { %1698 = vmatprep.subr.bf16.mxu1 %v1778_v15  ;;  %v818_v15 = vld [vmem:[#allocation8 + $0x28] sm:$0xff]  ;;  %v1550_v27 = vcombine.low %v813_v11, %v817_v13 }
  0x64   :  { %v1553_v26 = vcombine.high %v814_v14, %v818_v15 }
  0x65   :  { %1677 = vmatpush3.bf16.msra.mxu0 %v1779_v16  ;;  %v1877_v16 = vmov 0  }
  0x66   :  { %1699 = vmatpush3.bf16.msra.mxu1 %v1780_v18  ;;  %1239 = vmatprep.subr.bf16.mxu0 %v1607_v24  ;;  %v1947_v18 = vld [vmem:[#allocation8 + $0x1f0] sm:$0xff]  ;;  %v1551_v24 = vcombine.high %v813_v11, %v817_v13  ;;  %v860_v11 = vld [vmem:[#allocation8 + $0x178] sm:$0xff]  ;;  %v1604_v13 = vcombine.low %v864_v3, %v868_v4 }
  0x67   :  { %1280 = vmatprep.subr.bf16.mxu1 %v1609_v30 }
  0x68   :  { %764 = vmatmul.mubr.bf16.vlgmr.msra.gmra.mxu0 %v240_v17  ;;  %v1945_v17 = vld [vmem:[#allocation8 + $0x1d0] sm:$0xff] }
  0x69   :  { %804 = vmatmul.mubr.bf16.vlgmr.msra.gmra.mxu1 %v256_v19  ;;  %1240 = vmatpush1.bf16.msra.mxu0 %v1606_v23  ;;  %v1949_v19 = vld [vmem:[#allocation8 + $0x1d8] sm:$0xff]  ;;  %v1610_v21 = vcombine.low %v1945_v17, %v1947_v18  ;;  %v1560_v23 = vcombine.low %v822_v9, %v826_v10  ;;  %v1611_v30 = vcombine.high %v1945_v17, %v1947_v18  ;;  %v859_v9 = vld [vmem:[#allocation8 + $0x170] sm:$0xff] }
  0x6a   :  { %1281 = vmatpush1.bf16.msra.mxu1 %v1608_v28  ;;  %1241 = vmatprep.subr.bf16.mxu0 %v1599_v31  ;;  %v1612_v25 = vcombine.low %v1949_v19, %v1954_v22  ;;  %v1552_v28 = vcombine.low %v814_v14, %v818_v15  ;;  %v1613_v31 = vcombine.high %v1949_v19, %v1954_v22  ;;  %v856_v10 = vld [vmem:[#allocation8 + $0x158] sm:$0xff]  ;;  %v847_v19 = vld [vmem:[#allocation8 + $0x110] sm:$0xff] }
  0x6b   :  { %1282 = vmatprep.subr.bf16.mxu1 %v1601_v34  ;;  %1271 = vmatprep.mubr.bf16.mxu0 %v1877_v16  ;;  %v1597_v15 = vcombine.high %v856_v10, %v860_v11  ;;  %v848_v22 = vld [vmem:[#allocation8 + $0x118] sm:$0xff]  ;;  %v1596_v17 = vcombine.low %v856_v10, %v860_v11 }
  0x6c   :  { %1312 = vmatprep.mubr.bf16.mxu1 %v1877_v16 }
  0x6d   :  { %1242 = vmatpush1.bf16.msra.mxu0 %v1598_v36 }
  0x6e   :  { %1283 = vmatpush1.bf16.msra.mxu1 %v1600_v37  ;;  %1243 = vmatprep.subr.bf16.mxu0 %v1591_v41  ;;  %v199_v41 = vld [vmem:[%s2010_s4] sm:$0x1]  ;;  %s1878_s4 = smov [#allocation9]  }
  0x6f   :  { %1284 = vmatprep.subr.bf16.mxu1 %v1593_v45 }
  0x71   :  { %1244 = vmatpush1.bf16.msra.mxu0 %v1590_v43  ;;  %v201_v43 = vmul.f32 %v200_v42, %v199_v41  ;;  %v823_v42 = vld [vmem:[#allocation8 + $0x50] sm:$0xff] }
  0x72   :  { %1285 = vmatpush1.bf16.msra.mxu1 %v1592_v44  ;;  %1245 = vmatprep.subr.bf16.mxu0 %v1583_v49  ;;  %v198_v44 = vld [vmem:[%s2009_s3] sm:$0x1] }
  0x73   :  { %1286 = vmatprep.subr.bf16.mxu1 %v1585_v53  ;;  %v202_v45 = vadd.f32 %v201_v43, %v198_v44  ;;  %v827_v43 = vld [vmem:[#allocation8 + $0x70] sm:$0xff]  ;;  %v824_v44 = vld [vmem:[#allocation8 + $0x58] sm:$0xff] }
  0x75   :  { %1246 = vmatpush1.bf16.msra.mxu0 %v1582_v51  ;;  %v207_v47 = vrot.slane %v202_v45, %v206_v46  ;;  %v828_v45 = vld [vmem:[#allocation8 + $0x78] sm:$0xff] }
  0x76   :  { %1287 = vmatpush1.bf16.msra.mxu1 %v1584_v52  ;;  %1247 = vmatprep.subr.bf16.mxu0 %v1575_v57 }
  0x77   :  { %1288 = vmatprep.subr.bf16.mxu1 %v1577_v61 }
  0x79   :  { %1248 = vmatpush1.bf16.msra.mxu0 %v1574_v59 }
  0x7a   :  { %1289 = vmatpush1.bf16.msra.mxu1 %v1576_v60  ;;  %1249 = vmatprep.subr.bf16.mxu0 %v1567_v2  ;;  %v867_v2 = vld [vmem:[#allocation8 + $0x1b0] sm:$0xff] }
  0x7b   :  { %1290 = vmatprep.subr.bf16.mxu1 %v1569_v7  ;;  %v855_v7 = vld [vmem:[#allocation8 + $0x150] sm:$0xff] }
  0x7c   :  { %v1595_v14 = vcombine.high %v855_v7, %v859_v9 }
  0x7d   :  { %1250 = vmatpush1.bf16.msra.mxu0 %v1566_v1  ;;  %v863_v1 = vld [vmem:[#allocation8 + $0x190] sm:$0xff] }
  0x7e   :  { %1291 = vmatpush1.bf16.msra.mxu1 %v1568_v6  ;;  %1251 = vmatprep.subr.bf16.mxu0 %v1559_v8  ;;  %v1603_v5 = vcombine.high %v863_v1, %v867_v2  ;;  %v1605_v6 = vcombine.high %v864_v3, %v868_v4 }
  0x7f   :  { %1292 = vmatprep.subr.bf16.mxu1 %v1561_v12  ;;  %v1602_v12 = vcombine.low %v863_v1, %v867_v2 }
  0x81   :  { %1252 = vmatpush1.bf16.msra.mxu0 %v1558_v20  ;;  %v851_v20 = vld [vmem:[#allocation8 + $0x130] sm:$0xff] }
  0x82   :  { %1293 = vmatpush1.bf16.msra.mxu1 %v1560_v23  ;;  %1253 = vmatprep.subr.bf16.mxu0 %v1551_v24  ;;  %v852_v23 = vld [vmem:[#allocation8 + $0x138] sm:$0xff]  ;;  %v1594_v24 = vcombine.low %v855_v7, %v859_v9  ;;  %v1587_v18 = vcombine.high %v847_v19, %v851_v20  ;;  %v889_v7 = vsub.s32 2, %v1928_v29 }
  0x83   :  { %1294 = vmatprep.subr.bf16.mxu1 %v1553_v26  ;;  %v843_v26 = vld [vmem:[#allocation8 + $0xf0] sm:$0xff]  ;;  %v877_v9 = vld [vmem:[%s2012_s6] sm:$0xff]  ;;  %s1476_s6 = sshll.u32 %s1878_s4, 4  ;;  %s1477_s6 = int_to_ptr.vmem [resolvable:$true] %s1476_s6 }
  0x84   :  { %v882_v11 = vrot.slane %v877_v9, %v206_v46  ;;  %s1843_s23 = scalar_lea.vmem %s1477_s6, 128  ;;  %p1848_p2 = scmp.lt.s32.totalorder %s1477_s6, %s1477_s6 }
  0x85   :  { %1254 = vmatpush1.bf16.msra.mxu0 %v1550_v27  ;;  %v840_v27 = vld [vmem:[#allocation8 + $0xd8] sm:$0xff]  ;;  %p1844_p1 = scmp.ne.s32.totalorder %s1477_s6, %s1843_s23  ;;  %p1849_p3 = scmp.lt.s32.totalorder %s1843_s23, %s1843_s23 }
  0x86   :  { %1295 = vmatpush1.bf16.msra.mxu1 %v1552_v28  ;;  %1321 = vmatprep.subr.bf16.mxu0 %v1611_v30  ;;  %v844_v28 = vld [vmem:[#allocation8 + $0xf8] sm:$0xff]  ;;  %v1586_v30 = vcombine.low %v847_v19, %v851_v20  ;;  %v905_v19 = vsub.s32 6, %v1928_v29  ;;  %v901_v20 = vsub.s32 5, %v1928_v29 }
  0x87   :  { %1362 = vmatprep.subr.bf16.mxu1 %v1613_v31  ;;  %v1588_v31 = vcombine.low %v848_v22, %v852_v23  ;;  %p1850_p4 = por %p1849_p3, %p1848_p2 }
  0x89   :  { %p1851_p5 = pnand %p1850_p4, %p1844_p1 }
 0x108   :  { %v1634_v32 = vpop.f32.mrf.mxu0 }
 0x109   :  { %v1656_v33 = vpop.f32.mrf.mxu1 }
 0x10a   :  { %v1635_v34 = vpop.f32.mrf.mxu0 }
 0x10b   :  { %v1657_v36 = vpop.f32.mrf.mxu1  ;;  %v1636_v48 = vadd.f32 %v1635_v34, %v1634_v32  ;;  %v835_v34 = vld [vmem:[#allocation8 + $0xb0] sm:$0xff] }
 0x10c   :  { %v1637_v37 = vpop.f32.mrf.mxu0  ;;  %v1658_v50 = vadd.f32 %v1657_v36, %v1656_v33  ;;  %v831_v33 = vld [vmem:[#allocation8 + $0x90] sm:$0xff]  ;;  %v832_v36 = vld [vmem:[#allocation8 + $0x98] sm:$0xff] }
 0x10d   :  { %v1659_v38 = vpop.f32.mrf.mxu1  ;;  %v686_v49 = vadd.f32 %v1636_v48, %v207_v47  ;;  %v836_v37 = vld [vmem:[#allocation8 + $0xb8] sm:$0xff]  ;;  %v1570_v47 = vcombine.low %v831_v33, %v835_v34 }
 0x10e   :  { %v1638_v39 = vpop.f32.mrf.mxu0  ;;  %v1573_v41 = vcombine.high %v832_v36, %v836_v37  ;;  %v1572_v48 = vcombine.low %v832_v36, %v836_v37 }
 0x10f   :  { %v1660_v40 = vpop.f32.mrf.mxu1  ;;  %v726_v54 = vadd.f32 %v1658_v50, %v686_v49  ;;  %v1580_v39 = vcombine.low %v840_v27, %v844_v28  ;;  %v1563_v49 = vcombine.high %v823_v42, %v827_v43  ;;  %v1565_v50 = vcombine.high %v824_v44, %v828_v45 }
 0x110   :  { %v1571_v40 = vcombine.high %v831_v33, %v835_v34 }
 0x128   :  { %v1678_v51 = vpop.f32.mrf.mxu0 }
 0x129   :  { %v1700_v52 = vpop.f32.mrf.mxu1 }
 0x12a   :  { %v1679_v53 = vpop.f32.mrf.mxu0 }
 0x12b   :  { %v1680_v55 = vadd.f32 %v1679_v53, %v1678_v51  ;;  %v1701_v56 = vpop.f32.mrf.mxu1  ;;  %v815_v51 = vld [vmem:[#allocation8 + $0x10] sm:$0xff]  ;;  %v816_v53 = vld [vmem:[#allocation8 + $0x18] sm:$0xff] }
 0x12c   :  { %v1681_v57 = vpop.f32.mrf.mxu0  ;;  %v1702_v59 = vadd.f32 %v1701_v56, %v1700_v52  ;;  %v819_v52 = vld [vmem:[#allocation8 + $0x30] sm:$0xff]  ;;  %v1564_v56 = vcombine.low %v824_v44, %v828_v45 }
 0x12d   :  { %v766_v58 = vadd.f32 %v1680_v55, %v726_v54  ;;  %v1703_v60 = vpop.f32.mrf.mxu1  ;;  %v820_v54 = vld [vmem:[#allocation8 + $0x38] sm:$0xff]  ;;  %v1562_v55 = vcombine.low %v823_v42, %v827_v43  ;;  %v1555_v57 = vcombine.high %v815_v51, %v819_v52 }
 0x12e   :  { %v1682_v61 = vpop.f32.mrf.mxu0  ;;  %v1556_v60 = vcombine.low %v816_v53, %v820_v54 }
 0x12f   :  { %v806_v62 = vadd.f32 %v1702_v59, %v766_v58  ;;  %v1704_v63 = vpop.f32.mrf.mxu1  ;;  %v1557_v58 = vcombine.high %v816_v53, %v820_v54  ;;  %v1554_v59 = vcombine.low %v815_v51, %v819_v52 }
 0x131   :  { %v811_v0 = vpack.c.bf16 %v806_v62, %v806_v62 }
 0x133   :  { %1781 = vtanh.bf16 %v811_v0 }
 0x141   :  { %v1974_v8 = vpop.eup %1781 }
 0x142   :  { %1272 = vmatmul.mubr.bf16.vlgmr.msra.gmra.mxu0 %v1974_v8  ;;  %1313 = vmatmul.mubr.bf16.vlgmr.msra.gmra.mxu1 %v1974_v8 }
 0x143   :  { %1322 = vmatpush1.bf16.msra.mxu0 %v1610_v21  ;;  %1363 = vmatpush1.bf16.msra.mxu1 %v1612_v25  ;;  %v1589_v21 = vcombine.high %v848_v22, %v852_v23  ;;  %v839_v25 = vld [vmem:[#allocation8 + $0xd0] sm:$0xff]  ;;  %v909_v22 = vsub.s32 7, %v1928_v29 }
 0x144   :  { %1323 = vmatprep.subr.bf16.mxu0 %v1603_v5  ;;  %1364 = vmatprep.subr.bf16.mxu1 %v1605_v6  ;;  %v1579_v32 = vcombine.high %v839_v25, %v843_v26  ;;  %v1578_v38 = vcombine.low %v839_v25, %v843_v26  ;;  %v885_v5 = vsub.s32 1, %v1928_v29  ;;  %v893_v6 = vsub.s32 3, %v1928_v29 }
 0x145   :  { %1353 = vmatprep.mubr.bf16.mxu0 %v1877_v16  ;;  %1394 = vmatprep.mubr.bf16.mxu1 %v1877_v16  ;;  %v1581_v16 = vcombine.high %v840_v27, %v844_v28  ;;  %v906_v25 = vrot.slane %v877_v9, %v905_v19  ;;  %v902_v26 = vrot.slane %v877_v9, %v901_v20 }
 0x146   :  { %v886_v10 = vrot.slane %v877_v9, %v885_v5  ;;  %v910_v27 = vrot.slane %v877_v9, %v909_v22 }
 0x147   :  { %1324 = vmatpush1.bf16.msra.mxu0 %v1602_v12  ;;  %1365 = vmatpush1.bf16.msra.mxu1 %v1604_v13  ;;  %v890_v12 = vrot.slane %v877_v9, %v889_v7 }
 0x148   :  { %1325 = vmatprep.subr.bf16.mxu0 %v1595_v14  ;;  %1366 = vmatprep.subr.bf16.mxu1 %v1597_v15  ;;  %v897_v15 = vsub.s32 4, %v1928_v29 }
 0x14b   :  { %1326 = vmatpush1.bf16.msra.mxu0 %v1594_v24  ;;  %1367 = vmatpush1.bf16.msra.mxu1 %v1596_v17 }
 0x14c   :  { %1327 = vmatprep.subr.bf16.mxu0 %v1587_v18  ;;  %1368 = vmatprep.subr.bf16.mxu1 %v1589_v21  ;;  %v898_v21 = vrot.slane %v877_v9, %v897_v15 }
 0x14f   :  { %1328 = vmatpush1.bf16.msra.mxu0 %v1586_v30  ;;  %1369 = vmatpush1.bf16.msra.mxu1 %v1588_v31 }
 0x150   :  { %1329 = vmatprep.subr.bf16.mxu0 %v1579_v32  ;;  %1370 = vmatprep.subr.bf16.mxu1 %v1581_v16 }
 0x153   :  { %1330 = vmatpush1.bf16.msra.mxu0 %v1578_v38  ;;  %1371 = vmatpush1.bf16.msra.mxu1 %v1580_v39 }
 0x154   :  { %1331 = vmatprep.subr.bf16.mxu0 %v1571_v40  ;;  %1372 = vmatprep.subr.bf16.mxu1 %v1573_v41 }
 0x157   :  { %1332 = vmatpush1.bf16.msra.mxu0 %v1570_v47  ;;  %1373 = vmatpush1.bf16.msra.mxu1 %v1572_v48 }
 0x158   :  { %1333 = vmatprep.subr.bf16.mxu0 %v1563_v49  ;;  %1374 = vmatprep.subr.bf16.mxu1 %v1565_v50 }
 0x15b   :  { %1334 = vmatpush1.bf16.msra.mxu0 %v1562_v55  ;;  %1375 = vmatpush1.bf16.msra.mxu1 %v1564_v56 }
 0x15c   :  { %1335 = vmatprep.subr.bf16.mxu0 %v1555_v57  ;;  %1376 = vmatprep.subr.bf16.mxu1 %v1557_v58 }
 0x15f   :  { %1336 = vmatpush1.bf16.msra.mxu0 %v1554_v59  ;;  %1377 = vmatpush1.bf16.msra.mxu1 %v1556_v60 }
 0x162   :  { %1354 = vmatmul.mubr.bf16.vlgmr.msra.gmra.mxu0 %v1974_v8  ;;  %1395 = vmatmul.mubr.bf16.vlgmr.msra.gmra.mxu1 %v1974_v8  ;;  %v894_v8 = vrot.slane %v877_v9, %v893_v6 }
 0x202   :  { %v1273_v61 = vpop.f32.mrf.mxu0  ;;  %v1314_v62 = vpop.f32.mrf.mxu1 }
 0x203   :  { %v1274_v23 = vadd.f32 %v1273_v61, %v882_v11  ;;  %v1315_v24 = vadd.f32 %v1314_v62, %v890_v12 }
 0x204   :  { %v1275_v63 = vpop.f32.mrf.mxu0  ;;  %v1316_v0 = vpop.f32.mrf.mxu1 }
 0x205   :  { %v1276_v13 = vadd.f32 %v1275_v63, %v886_v10  ;;  %v1317_v14 = vadd.f32 %v1316_v0, %v894_v8 }
 0x206   :  { %v1277_v1 = vpop.f32.mrf.mxu0  ;;  %v1318_v2 = vpop.f32.mrf.mxu1 }
 0x207   :  { %v1614_v17 = vpack.c.bf16 %v1276_v13, %v1274_v23  ;;  %v1615_v18 = vpack.c.bf16 %v1317_v14, %v1315_v24 }
 0x208   :  { %v1278_v3 = vpop.f32.mrf.mxu0  ;;  %v1319_v4 = vpop.f32.mrf.mxu1 }
 0x209   :  { %v1429_v30 = vrot.slane %v1614_v17, %v1931_v35  ;;  %v1436_v31 = vrot.slane %v1615_v18, %v1931_v35 }
 0x20b   :  { %v1451_v43 = vcombine.low %v1429_v30, %v1436_v31 }
 0x20d   :  { %v1459_v48 = vrot.slane %v1451_v43, %v1931_v35 }
 0x222   :  { %v1355_v46 = vpop.f32.mrf.mxu0  ;;  %v1396_v28 = vpop.f32.mrf.mxu1 }
 0x223   :  { %v1356_v33 = vadd.f32 %v1355_v46, %v898_v21  ;;  %v1397_v34 = vadd.f32 %v1396_v28, %v906_v25 }
 0x224   :  { %v1357_v32 = vpop.f32.mrf.mxu0  ;;  %v1398_v16 = vpop.f32.mrf.mxu1 }
 0x225   :  { %v1358_v36 = vadd.f32 %v1357_v32, %v902_v26  ;;  %v1399_v29 = vadd.f32 %v1398_v16, %v910_v27 }
 0x226   :  { %v1359_v37 = vpop.f32.mrf.mxu0  ;;  %v1400_v38 = vpop.f32.mrf.mxu1 }
 0x227   :  { %v1616_v39 = vpack.c.bf16 %v1358_v36, %v1356_v33  ;;  %v1617_v40 = vpack.c.bf16 %v1399_v29, %v1397_v34 }
 0x228   :  { %v1360_v41 = vpop.f32.mrf.mxu0  ;;  %v1401_v42 = vpop.f32.mrf.mxu1 }
 0x229   :  { %v1443_v44 = vrot.slane %v1616_v39, %v1931_v35  ;;  %v1450_v45 = vrot.slane %v1617_v40, %v1931_v35 }
 0x22b   :  { %v1452_v47 = vcombine.low %v1443_v44, %v1450_v45 }
 0x22d   :  { %v1466_v49 = vrot.slane %v1452_v47, %v1931_v35 }
 0x22f   :  { %v1467_v50 = vcombine.low %v1459_v48, %v1466_v49 }
 0x231   :  { %1469 = vst [vmem:[#allocation9] sm:$0xff] %v1467_v50 }
 0x232   :  { %1854 = shalt.err (!%p1851_p5)
}
 0x233   :  { %1479 = dma.vmem_to_hbm [thread:$0]  %s1477_s6, 128, %s2013_s7, [#allocation5]  }
 0x234   :  { %1867 = dma.done.wait [#allocation5], 128  }
 0x235   :  { %1868 = vsyncadd [#allocation5], 4294967168 }
 0x236   :  { %1483 = vsyncpa [#allocation4], 1 }
 0x237   :  { %1484 = vsyncpa [#allocation7], 1 }
 0x238   :  { %1485 = vsyncpa [#allocation5], 1 }

</bundles_post_ra>
